<compile_context>
chip_gen: v6e
topology: v6e:2x2x1
jax: 0.10.0
libtpu: 0.0.40
codegen_flags: <defaults>
</compile_context>

<pallas_src>
import functools

import jax
import jax.numpy as jnp
from jax.experimental import pallas as pl
from jax.experimental.pallas import tpu as pltpu

EPS = 1e-5  # nn.InstanceNorm2d default

_BLOCK_BUDGET_BYTES = 12 * 1024 * 1024   # in+out (double buffered) + f32 temps
_VMEM_LIMIT_BYTES = 32 * 1024 * 1024     # safe on v5e/v6e/v7x


def _round_up(a, m):
    return pl.cdiv(a, m) * m


def _instance_norm_kernel(x_ref, gb_ref, o_ref, *, hw):
    # x_ref: (tr, HW) rows = (n, c) instances; reduce over the lane axis.
    # Block last dim is the full HW extent, so no masking is needed.
    x = x_ref[...].astype(jnp.float32)
    inv_n = jnp.float32(1.0 / hw)

    mean = jnp.sum(x, axis=-1, keepdims=True) * inv_n
    xc = x - mean
    var = jnp.sum(xc * xc, axis=-1, keepdims=True) * inv_n   # biased (PyTorch IN)
    inv = jax.lax.rsqrt(var + EPS)

    g = gb_ref[:, 0:1]        # (tr, 1) f32
    b = gb_ref[:, 1:2]        # (tr, 1) f32
    o_ref[...] = (xc * (inv * g) + b).astype(o_ref.dtype)


def _choose_tile_rows(nc, hw, dtype_bytes):
    """Sublane-aligned row tile: fits the VMEM block budget, targets >= 8
    (preferably even) grid steps so both v7x TensorCores stay busy."""
    sub = {4: 8, 2: 16, 1: 32}.get(dtype_bytes, 8)
    # Live VMEM per row: 2 pipeline buffers x (in + out) tile rows, plus
    # roughly two f32 full-tile intermediates (upcast x, centered xc).
    per_row = hw * (4 * dtype_bytes + 8)
    tr_cap = max(sub, (_BLOCK_BUDGET_BYTES // per_row) // sub * sub)
    tr_cap = min(tr_cap, 1024)                        # roofline saturates here
    tr_target = max(sub, _round_up(pl.cdiv(nc, 8), sub))   # >= 8 grid steps
    tr = max(sub, min(tr_cap, tr_target))

    # Prefer an even step count (v7x megacore load balance).
    steps = pl.cdiv(nc, tr)
    if steps > 1 and steps % 2 == 1:
        tr_even = max(sub, _round_up(pl.cdiv(nc, steps + 1), sub))
        if pl.cdiv(nc, tr_even) % 2 == 0:
            tr = tr_even

    # If there are fewer rows than one tile, use the exact row count
    # (block dim equal to the full array dim is always legal).
    return min(tr, max(nc, 1))


def instance_norm_2d(x, gamma, beta):
    """InstanceNorm2d(affine=True): x (N, C, H, W), gamma/beta (C,)."""
    N, C, H, W = x.shape
    NC, HW = N * C, H * W
    dtype_bytes = jnp.dtype(x.dtype).itemsize

    tr = _choose_tile_rows(NC, HW, dtype_bytes)
    grid = (pl.cdiv(NC, tr),)
    # TODO(synk): for very large H*W (a single (sublane, HW) tile exceeding the
    # VMEM budget, esp. on v7x's 64 MiB), add a second "arbitrary" grid axis
    # over HW with running sum / sum-of-squares accumulators.

    x2 = x.reshape(NC, HW)   # no-copy reshape; no HBM padding pass

    # Per-row affine params packed as (NC, 2): row = n*C + c -> [gamma[c], beta[c]].
    gb = jnp.stack(
        [jnp.tile(gamma.astype(jnp.float32), (N,)),
         jnp.tile(beta.astype(jnp.float32), (N,))],
        axis=-1)

    kernel = functools.partial(_instance_norm_kernel, hw=HW)

    out2 = pl.pallas_call(
        kernel,
        out_shape=jax.ShapeDtypeStruct((NC, HW), x.dtype),
        grid_spec=pltpu.PrefetchScalarGridSpec(
            num_scalar_prefetch=0,
            grid=grid,
            in_specs=[
                pl.BlockSpec((tr, HW), lambda i: (i, 0)),
                pl.BlockSpec((tr, 2), lambda i: (i, 0)),
            ],
            out_specs=pl.BlockSpec((tr, HW), lambda i: (i, 0)),
        ),
        compiler_params=pltpu.CompilerParams(
            dimension_semantics=("parallel",),
            vmem_limit_bytes=_VMEM_LIMIT_BYTES,
        ),
    )(x2, gb)

    return out2.reshape(N, C, H, W)


def pre_norm(x, gamma, beta, fn=lambda y: y):
    """PreNorm.forward: fn(InstanceNorm2d(x))."""
    # TODO(synk): gc.collect() / torch.cuda.empty_cache() have no JAX/Pallas
    # equivalent (XLA manages device memory); intentionally omitted.
    # TODO(synk): self.fn is an arbitrary sub-module in PyTorch; applied here
    # as a plain JAX callable (identity by default) after the norm kernel.
    return fn(instance_norm_2d(x, gamma, beta))


if __name__ == "__main__":
    key = jax.random.PRNGKey(0)

    def _reference(x, gamma, beta):
        mean = jnp.mean(x, axis=(2, 3), keepdims=True)
        var = jnp.mean((x - mean) ** 2, axis=(2, 3), keepdims=True)
        y = (x - mean) * jax.lax.rsqrt(var + EPS)
        return y * gamma[None, :, None, None] + beta[None, :, None, None]

    # Case 1: aligned shapes (H*W multiple of 128, N*C multiple of 8).
    N, C, H, W = 2, 4, 16, 16
    kx, kg, kb, key = jax.random.split(key, 4)
    x = jax.random.normal(kx, (N, C, H, W), dtype=jnp.float32)
    gamma = jnp.ones((C,), jnp.float32) + 0.1 * jax.random.normal(kg, (C,), jnp.float32)
    beta = 0.1 * jax.random.normal(kb, (C,), jnp.float32)
    out = jax.block_until_ready(pre_norm(x, gamma, beta, fn=lambda y: y))
    ref = _reference(x, gamma, beta)
    assert jnp.allclose(out, ref, atol=1e-5, rtol=1e-5), "mismatch (aligned case)"

    # Case 2: ragged shapes — non-128 lane extent and an overhanging last row
    # tile (exercises Pallas OOB block handling, no HBM padding copies).
    N, C, H, W = 3, 5, 10, 10
    kx, kg, kb, key = jax.random.split(key, 4)
    x = jax.random.normal(kx, (N, C, H, W), dtype=jnp.float32)
    gamma = jnp.ones((C,), jnp.float32) + 0.1 * jax.random.normal(kg, (C,), jnp.float32)
    beta = 0.1 * jax.random.normal(kb, (C,), jnp.float32)
    out = jax.block_until_ready(pre_norm(x, gamma, beta, fn=lambda y: y))
    ref = _reference(x, gamma, beta)
    assert jnp.allclose(out, ref, atol=1e-5, rtol=1e-5), "mismatch (ragged case)"

    print("KERNEL_OK")
</pallas_src>

<mosaic_0001>
module attributes {stable_mosaic.version = 11 : i64} {
  func.func @_instance_norm_kernel(%arg0: i32, %arg1: memref<8x256xf32, #tpu.memory_space<vmem>>, %arg2: memref<8x2xf32, #tpu.memory_space<vmem>>, %arg3: memref<8x256xf32, #tpu.memory_space<vmem>>) attributes {dimension_semantics = [#tpu.dimension_semantics<parallel>], iteration_bounds = array<i64: 1>, scalar_prefetch = 0 : i64, scratch_operands = 0 : i64, tpu.core_type = #tpu.core_type<tc>, window_params = [{transform_indices = @transform_0, window_bounds = array<i64: 8, 256>}, {transform_indices = @transform_1, window_bounds = array<i64: 8, 2>}, {transform_indices = @transform_2, window_bounds = array<i64: 8, 256>}]} {
    %c0 = arith.constant 0 : index
    %c0_0 = arith.constant 0 : index
    %0 = vector.load %arg1[%c0, %c0_0] : memref<8x256xf32, #tpu.memory_space<vmem>>, vector<8x256xf32>
    %cst = arith.constant dense<0.000000e+00> : vector<8xf32>
    %1 = vector.multi_reduction <add>, %0, %cst [1] : vector<8x256xf32> to vector<8xf32>
    %2 = vector.shape_cast %1 : vector<8xf32> to vector<8x1xf32>
    %cst_1 = arith.constant 3.906250e-03 : f32
    %3 = vector.broadcast %cst_1 : f32 to vector<8x1xf32>
    %4 = arith.mulf %2, %3 : vector<8x1xf32>
    %5 = vector.broadcast %4 : vector<8x1xf32> to vector<8x256xf32>
    %6 = arith.subf %0, %5 : vector<8x256xf32>
    %7 = arith.mulf %6, %6 : vector<8x256xf32>
    %cst_2 = arith.constant dense<0.000000e+00> : vector<8xf32>
    %8 = vector.multi_reduction <add>, %7, %cst_2 [1] : vector<8x256xf32> to vector<8xf32>
    %9 = vector.shape_cast %8 : vector<8xf32> to vector<8x1xf32>
    %cst_3 = arith.constant 3.906250e-03 : f32
    %10 = vector.broadcast %cst_3 : f32 to vector<8x1xf32>
    %11 = arith.mulf %9, %10 : vector<8x1xf32>
    %cst_4 = arith.constant 9.99999974E-6 : f32
    %12 = vector.broadcast %cst_4 : f32 to vector<8x1xf32>
    %13 = arith.addf %11, %12 : vector<8x1xf32>
    %14 = math.rsqrt %13 : vector<8x1xf32>
    %c0_5 = arith.constant 0 : index
    %c0_6 = arith.constant 0 : index
    %15 = vector.load %arg2[%c0_5, %c0_6] : memref<8x2xf32, #tpu.memory_space<vmem>>, vector<8x1xf32>
    %c0_7 = arith.constant 0 : index
    %c1 = arith.constant 1 : index
    %16 = vector.load %arg2[%c0_7, %c1] : memref<8x2xf32, #tpu.memory_space<vmem>>, vector<8x1xf32>
    %17 = arith.mulf %14, %15 : vector<8x1xf32>
    %18 = vector.broadcast %17 : vector<8x1xf32> to vector<8x256xf32>
    %19 = arith.mulf %6, %18 : vector<8x256xf32>
    %20 = vector.broadcast %16 : vector<8x1xf32> to vector<8x256xf32>
    %21 = arith.addf %19, %20 : vector<8x256xf32>
    %c0_8 = arith.constant 0 : index
    %c0_9 = arith.constant 0 : index
    %22 = vector.load %arg3[%c0_8, %c0_9] : memref<8x256xf32, #tpu.memory_space<vmem>>, vector<8x256xf32>
    tpu.vector_store %arg3[%c0_8, %c0_9], %21 {strides = array<i32>} : memref<8x256xf32, #tpu.memory_space<vmem>>, vector<8x256xf32>,
    return
  }
  func.func @transform_0(%arg0: i32) -> (i32, i32) {
    %c0_i32 = arith.constant 0 : i32
    %c0_i32_0 = arith.constant 0 : i32
    return %arg0, %c0_i32 : i32, i32
  }
  func.func @transform_1(%arg0: i32) -> (i32, i32) {
    %c0_i32 = arith.constant 0 : i32
    %c0_i32_0 = arith.constant 0 : i32
    return %arg0, %c0_i32 : i32, i32
  }
  func.func @transform_2(%arg0: i32) -> (i32, i32) {
    %c0_i32 = arith.constant 0 : i32
    %c0_i32_0 = arith.constant 0 : i32
    return %arg0, %c0_i32 : i32, i32
  }
}

</mosaic_0001>

<bundles_post_ra>
// kernel: tpu_custom_call.1
= control target key start
LH: loop header
LB: loop body
LE: loop exit
PB: predicated region body
PF: predicated region fallthrough
CT: control target
= control target key end

     0   :  { %7 = vsyncpa [#allocation3], 0  ;;  %s154_s0 = inlined_call_operand.hbm [shape: f32[8,256], index: 0, kind: input, shape index: {}]   ;;  %s155_s1 = inlined_call_operand.vmem [shape: f32[8,2], index: 1, kind: input, shape index: {}]   ;;  %s156_s2 = inlined_call_operand.hbm [shape: f32[8,256], index: 2, kind: output, shape index: {}]  }
   0x1   :  { %8 = vsyncpa [#allocation4], 0  ;;  %s126_s9 = smov [#allocation2]  }
   0x2   :  { %s15_s10 = sshll.u32 %s126_s9, 4  ;;  %s16_s10 = int_to_ptr.vmem [resolvable:$true] %s15_s10 }
   0x3   :  { %s90_s11 = scalar_lea.vmem %s16_s10, 256  ;;  %p95_p1 = scmp.lt.s32.totalorder %s16_s10, %s16_s10 }
   0x4   :  { %p91_p0 = scmp.ne.s32.totalorder %s16_s10, %s90_s11  ;;  %p96_p2 = scmp.lt.s32.totalorder %s90_s11, %s90_s11 }
   0x6   :  { %p97_p3 = por %p96_p2, %p95_p1 }
   0x8   :  { %p98_p4 = pnand %p97_p3, %p91_p0 }
   0xa   :  { %101 = shalt.err (!%p98_p4)
}
   0xb   :  { %18 = dma.hbm_to_vmem [thread:$0]  %s154_s0, 256, %s16_s10, [#allocation3]  }
   0xc   :  { %122 = dma.done.wait [#allocation3], 256  }
   0xd   :  { %123 = vsyncadd [#allocation3], 4294967040  ;;  %v24_v0 = vld [vmem:[#allocation2] sm:$0xff]  ;;  %v25_v1 = vld [vmem:[#allocation2 + $0x8] sm:$0xff]  ;;  %v127_v10 = vmov 0   ;;  %v128_v11 = vmov 1  }
   0xe   :  { %v26_v2 = vadd.f32 %v25_v1, %v24_v0  ;;  %77 = vset.pattern.permute.xlu1 %v127_v10  ;;  %79 = vset.pattern.permute.xlu0 %v128_v11  ;;  %v40_v15 = vld [vmem:[%s155_s1] sm:$0xff]  ;;  %s129_s15 = smov [#allocation5]  }
   0xf   :  { %s64_s16 = sshll.u32 %s129_s15, 4  ;;  %s65_s16 = int_to_ptr.vmem [resolvable:$true] %s64_s16 }
  0x10   :  { %27 = vadd.xlane.f32.xlu0 %v26_v2  ;;  %s102_s17 = scalar_lea.vmem %s65_s16, 256  ;;  %p107_p6 = scmp.lt.s32.totalorder %s65_s16, %s65_s16 }
  0x11   :  { %p103_p5 = scmp.ne.s32.totalorder %s65_s16, %s102_s17  ;;  %p108_p7 = scmp.lt.s32.totalorder %s102_s17, %s102_s17 }
  0x13   :  { %p109_p8 = por %p108_p7, %p107_p6 }
  0x15   :  { %p110_p9 = pnand %p109_p8, %p103_p5 }
  0x99   :  { %v28_v3 = vpop.xlane.xlu0 %27 }
  0x9a   :  { %v29_v4 = vmul.f32 0.00390625, %v28_v3 }
  0x9c   :  { %v30_v5 = vsub.f32 %v24_v0, %v29_v4  ;;  %v31_v6 = vsub.f32 %v25_v1, %v29_v4 }
  0x9e   :  { %v32_v7 = vmul.f32 %v30_v5, %v30_v5  ;;  %v33_v8 = vmul.f32 %v31_v6, %v31_v6 }
  0xa0   :  { %v34_v9 = vadd.f32 %v33_v8, %v32_v7 }
  0xa2   :  { %35 = vadd.xlane.f32.xlu0 %v34_v9 }
 0x12b   :  { %v36_v12 = vpop.xlane.xlu0 %35 }
 0x12c   :  { %v37_v13 = vmul.f32 0.00390625, %v36_v12 }
 0x12e   :  { %v38_v14 = vadd.f32 1e-05, %v37_v13 }
 0x130   :  { %80 = vrsqrt.f32 %v38_v14 }
 0x13d   :  { %v81_v16 = vpop.eup %80 }
 0x13e   :  { %v41_v17 = vmul.f32 %v81_v16, %v40_v15 }
 0x140   :  { %44 = vperm.xlu1 %77, %v41_v17  }
 0x144   :  { %78 = vset.pattern.permute.xlu1 %v128_v11 }
 0x145   :  { %51 = vperm.xlu1 %78, %v40_v15  }
 0x1bb   :  { %v45_v18 = vpop.permute.xlu1 %44 }
 0x1bc   :  { %v47_v19 = vmul.f32 %v45_v18, %v30_v5  ;;  %v48_v20 = vmul.f32 %v45_v18, %v31_v6 }
 0x1c0   :  { %v52_v21 = vpop.permute.xlu1 %51 }
 0x1c1   :  { %v54_v22 = vadd.f32 %v52_v21, %v47_v19  ;;  %v55_v23 = vadd.f32 %v52_v21, %v48_v20 }
 0x1c3   :  { %56 = vst [vmem:[#allocation5] sm:$0xff] %v54_v22  ;;  %57 = vst [vmem:[#allocation5 + $0x8] sm:$0xff] %v55_v23 }
 0x1c4   :  { %113 = shalt.err (!%p110_p9)
}
 0x1c5   :  { %67 = dma.vmem_to_hbm [thread:$0]  %s65_s16, 256, %s156_s2, [#allocation4]  }
 0x1c6   :  { %124 = dma.done.wait [#allocation4], 256  }
 0x1c7   :  { %125 = vsyncadd [#allocation4], 4294967040 }
 0x1c8   :  { %71 = vsyncpa [#allocation3], 1 }
 0x1c9   :  { %72 = vsyncpa [#allocation4], 1 }

</bundles_post_ra>
